<compile_context>
chip_gen: v7x
topology: tpu7x:2x2x1
jax: 0.10.0
libtpu: 0.0.40
codegen_flags: <defaults>
</compile_context>

<pallas_src>
import functools

import jax
import jax.numpy as jnp
from jax.experimental import pallas as pl
from jax.experimental.pallas import tpu as pltpu


# ----------------------------- Pallas kernels ------------------------------ #

def _fused_cls_kernel(logits_ref, tgt_ref, out_ref, *, num_classes, eos_coef):
    """Fused classification statistics for one batch tile of one decoder layer.

    Blocks:
      logits_ref : [BT, Q, K]  pred logits (native dtype)
      tgt_ref    : [BT, Q]     int32 matched target class per query
                               (num_classes == K-1 means "no object")
      out_ref    : [1, 8]      SMEM partial sums for this tile:
         [0] sum w_t * nll      [1] sum w_t
         [2] sum_b |card_pred_b - n_gt_b|
         [3] #correct matched   [4] #matched        [5..7] unused (zeroed)
    """
    lg_n = logits_ref[...]                                  # [BT, Q, K] native
    tgt = tgt_ref[...][:, :, None]                          # [BT, Q, 1] int32
    K = lg_n.shape[-1]
    cls_iota = jax.lax.broadcasted_iota(jnp.int32, (1, 1, K), 2)

    # ---- first-max argmax in the native dtype; shared by cardinality,
    #      class-error and the log-sum-exp max shift.  Ties resolve to the
    #      lower (foreground) index, matching torch.argmax / topk. ----
    mx_n = jnp.max(lg_n, axis=-1, keepdims=True)            # [BT, Q, 1]
    amax = jnp.min(jnp.where(lg_n == mx_n, cls_iota, K),
                   axis=-1, keepdims=True)                  # [BT, Q, 1] int32

    # ---- weighted softmax cross-entropy (loss_ce) ----
    lg = lg_n.astype(jnp.float32)
    mx = mx_n.astype(jnp.float32)
    lse = jnp.log(jnp.sum(jnp.exp(lg - mx), axis=-1, keepdims=True)) + mx
    logit_t = jnp.sum(jnp.where(cls_iota == tgt, lg, 0.0),
                      axis=-1, keepdims=True)               # [BT, Q, 1]
    nll = lse - logit_t
    matched = tgt != num_classes                            # [BT, Q, 1] bool
    wt = jnp.where(matched, jnp.float32(1.0), jnp.float32(eos_coef))
    ce_num = jnp.sum(nll * wt)
    ce_den = jnp.sum(wt)

    # ---- cardinality error: |#(argmax != no-object) - #GT| per image.
    # The per-image GT count is recovered as the number of matched queries;
    # identical to len(t["labels"]) for any matcher that assigns every GT to a
    # distinct query (Hungarian / identity). ----
    matched_f = matched.astype(jnp.float32)
    non_empty = (amax != (K - 1)).astype(jnp.float32)       # [BT, Q, 1]
    tlen = jnp.sum(matched_f, axis=1, keepdims=True)        # [BT, 1, 1]
    card_pred = jnp.sum(non_empty, axis=1, keepdims=True)   # [BT, 1, 1]
    card_err = jnp.sum(jnp.abs(card_pred - tlen))

    # ---- top-1 class error statistics over matched queries ----
    correct = jnp.sum(jnp.logical_and(matched, amax == tgt).astype(jnp.float32))
    n_match = jnp.sum(matched_f)

    out_ref[0, 0] = ce_num
    out_ref[0, 1] = ce_den
    out_ref[0, 2] = card_err
    out_ref[0, 3] = correct
    out_ref[0, 4] = n_match
    out_ref[0, 5] = 0.0
    out_ref[0, 6] = 0.0
    out_ref[0, 7] = 0.0


def _boxes_kernel(src_ref, tgt_ref, mask_ref, out_ref):
    """L1 + (1 - GIoU) sums over matched (padded + masked) pairs, all layers.

    src_ref / tgt_ref : [L, 4, NPAD]  (cx, cy, w, h) lane-dense, zero padded
    mask_ref          : [L, 1, NPAD]  1.0 for valid pairs, 0.0 for padding
    out_ref           : [L, 2] SMEM   (l1 sum, giou sum) per layer

    The whole working set is tiny, so one un-gridded invocation, statically
    unrolled over the (small) number of decoder layers, avoids per-grid-step
    overhead and a second round of DMAs.
    """
    eps = jnp.float32(1e-12)
    L = src_ref.shape[0]
    for l in range(L):                      # static unroll over decoder layers
        s = src_ref[l].astype(jnp.float32)                  # [4, NPAD]
        t = tgt_ref[l].astype(jnp.float32)                  # [4, NPAD]
        m = mask_ref[l].astype(jnp.float32)                 # [1, NPAD]

        l1 = jnp.sum(jnp.abs(s - t) * m)

        def to_xyxy(b):
            cx, cy, w, h = b[0:1], b[1:2], b[2:3], b[3:4]   # [1, NPAD] rows
            return cx - 0.5 * w, cy - 0.5 * h, cx + 0.5 * w, cy + 0.5 * h

        sx1, sy1, sx2, sy2 = to_xyxy(s)
        tx1, ty1, tx2, ty2 = to_xyxy(t)
        area_s = (sx2 - sx1) * (sy2 - sy1)
        area_t = (tx2 - tx1) * (ty2 - ty1)
        iw = jnp.maximum(jnp.minimum(sx2, tx2) - jnp.maximum(sx1, tx1), 0.0)
        ih = jnp.maximum(jnp.minimum(sy2, ty2) - jnp.maximum(sy1, ty1), 0.0)
        inter = iw * ih
        union = area_s + area_t - inter
        iou = inter / jnp.maximum(union, eps)
        ew = jnp.maximum(sx2, tx2) - jnp.minimum(sx1, tx1)
        eh = jnp.maximum(sy2, ty2) - jnp.minimum(sy1, ty1)
        enc = ew * eh
        giou = iou - (enc - union) / jnp.maximum(enc, eps)

        out_ref[l, 0] = l1
        out_ref[l, 1] = jnp.sum((1.0 - giou) * m)


# ----------------------------- kernel wrappers ------------------------------ #

def _vmem_capacity_bytes():
    try:
        return int(pltpu.get_tpu_info().vmem_capacity_bytes)
    except Exception:
        return 64 << 20                      # conservative (v7x per-TC) default


def _pick_batch_tile(B, Q, K):
    """Largest valid batch tile whose f32 logits block fits the VMEM budget.

    The budget leaves room for double-buffered inputs plus ~4 live full-tile
    f32 intermediates (so it is also safe on v7x's 64 MiB VMEM).  Valid tiles
    keep the target-class block (BT, Q) tileable: BT == B or BT % 8 == 0.
    """
    target_block_bytes = max(_vmem_capacity_bytes() // 12, 1 << 20)
    candidates = [bt for bt in range(1, B + 1)
                  if B % bt == 0 and (bt == B or bt % 8 == 0)]
    best = min(candidates)
    for bt in candidates:
        if bt * Q * K * 4 <= target_block_bytes:
            best = max(best, bt)
    return best


def _vmem_limit_bytes(block_bytes):
    vmem = _vmem_capacity_bytes()
    want = max(32 << 20, 8 * block_bytes)
    return int(min(want, (vmem * 3) // 4))


def classification_stats(logits, target_classes, num_classes, eos_coef):
    """Fused CE / cardinality / class-error statistics for ONE decoder layer.

    logits [B, Q, K] (native dtype), target_classes [B, Q] int32.
    Returns an 8-vector: (ce_num, ce_den, card_err_sum, n_correct, n_match, 0, 0, 0).
    """
    B, Q, K = logits.shape
    BT = _pick_batch_tile(B, Q, K)
    nb = B // BT
    block_bytes = BT * Q * K * 4

    out = pl.pallas_call(
        functools.partial(_fused_cls_kernel,
                          num_classes=int(num_classes),
                          eos_coef=float(eos_coef)),
        out_shape=jax.ShapeDtypeStruct((nb, 8), jnp.float32),
        grid_spec=pltpu.PrefetchScalarGridSpec(
            num_scalar_prefetch=0,
            grid=(nb,),
            in_specs=[
                pl.BlockSpec((BT, Q, K), lambda b: (b, 0, 0)),
                pl.BlockSpec((BT, Q), lambda b: (b, 0)),
            ],
            # Distinct SMEM output block per batch tile: the grid axis is
            # fully independent and can be sharded across TensorCores (v7x).
            out_specs=pl.BlockSpec((1, 8), lambda b: (b, 0),
                                   memory_space=pltpu.MemorySpace.SMEM),
        ),
        compiler_params=pltpu.CompilerParams(
            dimension_semantics=("parallel",),
            vmem_limit_bytes=_vmem_limit_bytes(block_bytes)),
    )(logits, target_classes)
    return jnp.sum(out, axis=0)                              # [8]


def box_losses_stacked(src_boxes, target_boxes, mask):
    """src/target_boxes [L,4,NPAD] (lane-dense), mask [L,1,NPAD].
    Returns per-layer (l1_sum, giou_sum), each shape [L]."""
    L = src_boxes.shape[0]
    out = pl.pallas_call(
        _boxes_kernel,
        out_shape=jax.ShapeDtypeStruct((L, 2), jnp.float32),
        in_specs=[
            pl.BlockSpec(memory_space=pltpu.MemorySpace.VMEM),
            pl.BlockSpec(memory_space=pltpu.MemorySpace.VMEM),
            pl.BlockSpec(memory_space=pltpu.MemorySpace.VMEM),
        ],
        out_specs=pl.BlockSpec(memory_space=pltpu.MemorySpace.SMEM),
    )(src_boxes, target_boxes, mask)
    return out[:, 0], out[:, 1]


# ------------------------------- SetCriterion ------------------------------- #

def _round_up(n, m):
    return -(-n // m) * m


class IdentityMatcher:
    """Deterministic stand-in for the Hungarian matcher (scipy
    linear_sum_assignment has no Pallas equivalent): query i <-> target i."""

    def __call__(self, outputs, targets):
        return [
            (jnp.arange(len(t["labels"]), dtype=jnp.int32),
             jnp.arange(len(t["labels"]), dtype=jnp.int32))
            for t in targets
        ]


class SetCriterionPallas:
    def __init__(self, num_classes, matcher, weight_dict, eos_coef, losses):
        self.num_classes = num_classes
        self.matcher = matcher
        self.weight_dict = weight_dict
        self.eos_coef = eos_coef
        self.losses = losses
        # Kept for parity with the reference buffer.  NOTE: the kernel hardcodes
        # the DETR default weighting (all ones, eos_coef on no-object); a fully
        # general per-class empty_weight would need to be threaded into it.
        self.empty_weight = (
            jnp.ones((num_classes + 1,), jnp.float32).at[-1].set(eos_coef)
        )

    # -------------------------- index helpers -------------------------- #

    def _padded_match_arrays(self, targets, indices, npad):
        """Concatenate matcher indices + labels and pad to a fixed length.

        Padding entries get batch index == B (out of bounds), so scatters use
        mode='drop' and gathers are clamped + masked downstream.  Fixed npad
        keeps kernel-facing shapes independent of the per-batch GT count.
        """
        B = len(targets)
        batch_idx = jnp.concatenate(
            [jnp.full_like(src, i) for i, (src, _) in enumerate(indices)]
        ).astype(jnp.int32)
        src_idx = jnp.concatenate([src for src, _ in indices]).astype(jnp.int32)
        labels = jnp.concatenate(
            [t["labels"][J] for t, (_, J) in zip(targets, indices)]
        ).astype(jnp.int32)
        n = int(src_idx.shape[0])
        pad = npad - n
        batch_idx = jnp.pad(batch_idx, (0, pad), constant_values=B)
        src_idx = jnp.pad(src_idx, (0, pad))
        labels = jnp.pad(labels, (0, pad), constant_values=self.num_classes)
        return batch_idx, src_idx, labels, n

    def _build_target_classes(self, B, Q, targets, indices, npad):
        batch_idx, src_idx, labels, _ = self._padded_match_arrays(
            targets, indices, npad)
        tc = jnp.full((B, Q), self.num_classes, dtype=jnp.int32)
        return tc.at[batch_idx, src_idx].set(labels, mode="drop")   # [B, Q]

    def _gather_matched_boxes(self, pred_boxes, targets, indices, npad):
        B = len(targets)
        batch_idx, src_idx, _, n = self._padded_match_arrays(
            targets, indices, npad)
        src = pred_boxes[jnp.minimum(batch_idx, B - 1), src_idx]     # [NPAD, 4]
        tgt = jnp.concatenate(
            [t["boxes"][i] for t, (_, i) in zip(targets, indices)], axis=0)
        tgt = jnp.pad(tgt, ((0, npad - n), (0, 0)))                  # [NPAD, 4]
        mask = (jnp.arange(npad) < n).astype(jnp.float32)[None, :]   # [1, NPAD]
        return src.T, tgt.T, mask               # lane-dense [4, NPAD] layouts

    # ------------------------------ forward ----------------------------- #

    def forward(self, outputs, targets):
        for loss in self.losses:
            assert loss in ("labels", "cardinality", "boxes", "masks"), (
                f"do you really want to compute {loss} loss?")
        if "masks" in self.losses:
            # TODO(synk): 'masks' loss (NestedTensor padding + bilinear
            # interpolate + focal/dice) not translated to Pallas.
            raise NotImplementedError("masks loss not supported in Pallas port")

        outputs_without_aux = {k: v for k, v in outputs.items()
                               if k != "aux_outputs"}
        indices = self.matcher(outputs_without_aux, targets)

        # TODO(synk): the reference all-reduces num_boxes over data-parallel
        # replicas (dist.all_reduce / world_size); single-replica here.
        num_boxes = max(float(sum(len(t["labels"]) for t in targets)), 1.0)

        aux_list = list(outputs.get("aux_outputs", []))
        layer_outs = [outputs_without_aux] + aux_list
        layer_idx = [indices] + [self.matcher(a, targets) for a in aux_list]
        L = len(layer_outs)

        B, Q, _ = outputs_without_aux["pred_logits"].shape
        # Fixed padded match count (total matches <= B*Q): kernel-facing shapes
        # do not depend on the per-batch GT count.
        npad = _round_up(max(B * Q, 1), 128)

        losses = {}
        want_labels = "labels" in self.losses
        want_card = "cardinality" in self.losses
        want_boxes = "boxes" in self.losses

        # ---- fused classification stats, one kernel launch per decoder layer
        #      (no [L,B,Q,K] stacking copy: each layer's logits are read
        #      directly from the model's output buffer). ----
        if want_labels or want_card:
            for l, (outs, idx) in enumerate(zip(layer_outs, layer_idx)):
                suf = "" if l == 0 else f"_{l - 1}"
                tgt_cls = self._build_target_classes(B, Q, targets, idx, npad)
                stats = classification_stats(
                    outs["pred_logits"], tgt_cls,
                    self.num_classes, self.eos_coef)
                if want_labels:
                    losses[f"loss_ce{suf}"] = stats[0] / stats[1]
                    if l == 0:
                        losses["class_error"] = (
                            100.0 - 100.0 * stats[3]
                            / jnp.maximum(stats[4], 1.0))
                if want_card:
                    losses[f"cardinality_error{suf}"] = stats[2] / B

        # ---- box losses (L1 + GIoU): tiny working set, single un-gridded
        #      call over all layers in a lane-dense padded layout. ----
        if want_boxes:
            gathered = [self._gather_matched_boxes(o["pred_boxes"], targets,
                                                   idx, npad)
                        for o, idx in zip(layer_outs, layer_idx)]
            src_stack = jnp.stack([g[0] for g in gathered])      # [L, 4, NPAD]
            tgt_stack = jnp.stack([g[1] for g in gathered])
            mask_stack = jnp.stack([g[2] for g in gathered])     # [L, 1, NPAD]
            l1_sum, giou_sum = box_losses_stacked(src_stack, tgt_stack,
                                                  mask_stack)
            for l in range(L):
                suf = "" if l == 0 else f"_{l - 1}"
                losses[f"loss_bbox{suf}"] = l1_sum[l] / num_boxes
                losses[f"loss_giou{suf}"] = giou_sum[l] / num_boxes

        return losses


# ----------------------------------- main ----------------------------------- #

if __name__ == "__main__":
    key = jax.random.PRNGKey(0)
    B, Q, num_classes = 2, 8, 4
    K = num_classes + 1
    n_t = 3       # ground-truth boxes per image
    n_aux = 2     # auxiliary decoder layers

    keys = jax.random.split(key, 4 + 2 * (n_aux + 1))

    def make_layer(k_logit, k_box):
        logits = jax.random.normal(k_logit, (B, Q, K), jnp.float32)
        boxes = (jax.nn.sigmoid(jax.random.normal(k_box, (B, Q, 4), jnp.float32))
                 * 0.5 + 0.1)
        return {"pred_logits": logits, "pred_boxes": boxes}

    main_out = make_layer(keys[0], keys[1])
    aux_outs = [make_layer(keys[2 + 2 * i], keys[3 + 2 * i])
                for i in range(n_aux)]

    k_lab, k_cxcy, k_wh = keys[-3], keys[-2], keys[-1]
    labels = jax.random.randint(k_lab, (B, n_t), 0, num_classes, jnp.int32)
    cxcy = jax.random.uniform(k_cxcy, (B, n_t, 2), jnp.float32,
                              minval=0.3, maxval=0.7)
    wh = jax.random.uniform(k_wh, (B, n_t, 2), jnp.float32,
                            minval=0.1, maxval=0.3)
    targets = [
        {"labels": labels[b],
         "boxes": jnp.concatenate([cxcy[b], wh[b]], axis=-1)}
        for b in range(B)
    ]

    outputs = dict(main_out)
    outputs["aux_outputs"] = aux_outs

    criterion = SetCriterionPallas(
        num_classes=num_classes,
        matcher=IdentityMatcher(),
        weight_dict={"loss_ce": 1.0, "loss_bbox": 5.0, "loss_giou": 2.0},
        eos_coef=0.1,
        losses=["labels", "boxes", "cardinality"],
    )

    losses = criterion.forward(outputs, targets)
    losses = jax.tree_util.tree_map(jax.block_until_ready, losses)
    print("KERNEL_OK")
</pallas_src>

<mosaic_0001>
module attributes {stable_mosaic.version = 11 : i64} {
  func.func @_fused_cls_kernel(%arg0: i32, %arg1: memref<2x8x5xf32, #tpu.memory_space<vmem>>, %arg2: memref<2x8xi32, #tpu.memory_space<vmem>>, %arg3: memref<1x8xf32, #tpu.memory_space<smem>>) attributes {dimension_semantics = [#tpu.dimension_semantics<parallel>], iteration_bounds = array<i64: 1>, scalar_prefetch = 0 : i64, scratch_operands = 0 : i64, tpu.core_type = #tpu.core_type<tc>, window_params = [{transform_indices = @transform_0, window_bounds = array<i64: 2, 8, 5>}, {transform_indices = @transform_1, window_bounds = array<i64: 2, 8>}, {transform_indices = @transform_2, window_bounds = array<i64: 1, 8>}]} {
    %c0 = arith.constant 0 : index
    %c0_0 = arith.constant 0 : index
    %c0_1 = arith.constant 0 : index
    %0 = vector.load %arg1[%c0, %c0_0, %c0_1] : memref<2x8x5xf32, #tpu.memory_space<vmem>>, vector<2x8x5xf32>
    %c0_2 = arith.constant 0 : index
    %c0_3 = arith.constant 0 : index
    %1 = vector.load %arg2[%c0_2, %c0_3] : memref<2x8xi32, #tpu.memory_space<vmem>>, vector<2x8xi32>
    %2 = vector.shape_cast %1 : vector<2x8xi32> to vector<2x8x1xi32>
    %3 = tpu.iota {dimensions = array<i32: 2>} : vector<1x1x5xi32>
    %cst = arith.constant dense<0xFF800000> : vector<2x8xf32>
    %4 = vector.multi_reduction <maximumf>, %0, %cst [2] : vector<2x8x5xf32> to vector<2x8xf32>
    %5 = vector.shape_cast %4 : vector<2x8xf32> to vector<2x8x1xf32>
    %6 = vector.broadcast %5 : vector<2x8x1xf32> to vector<2x8x5xf32>
    %7 = arith.cmpf oeq, %0, %6 : vector<2x8x5xf32>
    %c5_i32 = arith.constant 5 : i32
    %8 = vector.shape_cast %3 : vector<1x1x5xi32> to vector<1x1x5xi32>
    %9 = vector.broadcast %8 : vector<1x1x5xi32> to vector<2x8x5xi32>
    %10 = vector.broadcast %c5_i32 : i32 to vector<2x8x5xi32>
    %11 = arith.select %7, %9, %10 : vector<2x8x5xi1>, vector<2x8x5xi32>
    %cst_4 = arith.constant dense<2147483647> : vector<2x8xi32>
    %12 = vector.multi_reduction <minsi>, %11, %cst_4 [2] : vector<2x8x5xi32> to vector<2x8xi32>
    %13 = vector.shape_cast %12 : vector<2x8xi32> to vector<2x8x1xi32>
    %14 = vector.broadcast %5 : vector<2x8x1xf32> to vector<2x8x5xf32>
    %15 = arith.subf %0, %14 : vector<2x8x5xf32>
    %16 = math.exp %15 : vector<2x8x5xf32>
    %cst_5 = arith.constant dense<0.000000e+00> : vector<2x8xf32>
    %17 = vector.multi_reduction <add>, %16, %cst_5 [2] : vector<2x8x5xf32> to vector<2x8xf32>
    %18 = vector.shape_cast %17 : vector<2x8xf32> to vector<2x8x1xf32>
    %19 = math.log %18 : vector<2x8x1xf32>
    %20 = arith.addf %19, %5 : vector<2x8x1xf32>
    %21 = vector.broadcast %3 : vector<1x1x5xi32> to vector<2x8x5xi32>
    %22 = vector.broadcast %2 : vector<2x8x1xi32> to vector<2x8x5xi32>
    %23 = arith.cmpi eq, %21, %22 : vector<2x8x5xi32>
    %cst_6 = arith.constant 0.000000e+00 : f32
    %24 = vector.broadcast %cst_6 : f32 to vector<2x8x5xf32>
    %25 = arith.select %23, %0, %24 : vector<2x8x5xi1>, vector<2x8x5xf32>
    %cst_7 = arith.constant dense<0.000000e+00> : vector<2x8xf32>
    %26 = vector.multi_reduction <add>, %25, %cst_7 [2] : vector<2x8x5xf32> to vector<2x8xf32>
    %27 = vector.shape_cast %26 : vector<2x8xf32> to vector<2x8x1xf32>
    %28 = arith.subf %20, %27 : vector<2x8x1xf32>
    %c4_i32 = arith.constant 4 : i32
    %29 = vector.broadcast %c4_i32 : i32 to vector<2x8x1xi32>
    %30 = arith.cmpi ne, %2, %29 : vector<2x8x1xi32>
    %cst_8 = arith.constant 1.000000e+00 : f32
    %cst_9 = arith.constant 1.000000e-01 : f32
    %31 = vector.broadcast %cst_8 : f32 to vector<2x8x1xf32>
    %32 = vector.broadcast %cst_9 : f32 to vector<2x8x1xf32>
    %33 = arith.select %30, %31, %32 : vector<2x8x1xi1>, vector<2x8x1xf32>
    %34 = arith.mulf %28, %33 : vector<2x8x1xf32>
    %35 = vector.shape_cast %34 : vector<2x8x1xf32> to vector<1x2x8x1xf32>
    %cst_10 = arith.constant dense<0.000000e+00> : vector<1xf32>
    %36 = vector.multi_reduction <add>, %35, %cst_10 [1, 2, 3] : vector<1x2x8x1xf32> to vector<1xf32>
    %37 = vector.shape_cast %36 : vector<1xf32> to vector<1x1x1x1xf32>
    %38 = vector.extract %37[0, 0, 0, 0] : f32 from vector<1x1x1x1xf32>
    %39 = vector.shape_cast %33 : vector<2x8x1xf32> to vector<1x2x8x1xf32>
    %cst_11 = arith.constant dense<0.000000e+00> : vector<1xf32>
    %40 = vector.multi_reduction <add>, %39, %cst_11 [1, 2, 3] : vector<1x2x8x1xf32> to vector<1xf32>
    %41 = vector.shape_cast %40 : vector<1xf32> to vector<1x1x1x1xf32>
    %42 = vector.extract %41[0, 0, 0, 0] : f32 from vector<1x1x1x1xf32>
    %43 = arith.extui %30 : vector<2x8x1xi1> to vector<2x8x1xi32>
    %44 = arith.sitofp %43 : vector<2x8x1xi32> to vector<2x8x1xf32>
    %c4_i32_12 = arith.constant 4 : i32
    %45 = vector.broadcast %c4_i32_12 : i32 to vector<2x8x1xi32>
    %46 = arith.cmpi ne, %13, %45 : vector<2x8x1xi32>
    %47 = arith.extui %46 : vector<2x8x1xi1> to vector<2x8x1xi32>
    %48 = arith.sitofp %47 : vector<2x8x1xi32> to vector<2x8x1xf32>
    %cst_13 = arith.constant dense<0.000000e+00> : vector<2x1xf32>
    %49 = vector.multi_reduction <add>, %44, %cst_13 [1] : vector<2x8x1xf32> to vector<2x1xf32>
    %50 = vector.shape_cast %49 : vector<2x1xf32> to vector<2x1x1xf32>
    %cst_14 = arith.constant dense<0.000000e+00> : vector<2x1xf32>
    %51 = vector.multi_reduction <add>, %48, %cst_14 [1] : vector<2x8x1xf32> to vector<2x1xf32>
    %52 = vector.shape_cast %51 : vector<2x1xf32> to vector<2x1x1xf32>
    %53 = arith.subf %52, %50 : vector<2x1x1xf32>
    %54 = math.absf %53 : vector<2x1x1xf32>
    %55 = vector.shape_cast %54 : vector<2x1x1xf32> to vector<1x2x1x1xf32>
    %cst_15 = arith.constant dense<0.000000e+00> : vector<1xf32>
    %56 = vector.multi_reduction <add>, %55, %cst_15 [1, 2, 3] : vector<1x2x1x1xf32> to vector<1xf32>
    %57 = vector.shape_cast %56 : vector<1xf32> to vector<1x1x1x1xf32>
    %58 = vector.extract %57[0, 0, 0, 0] : f32 from vector<1x1x1x1xf32>
    %59 = arith.cmpi eq, %13, %2 : vector<2x8x1xi32>
    %60 = arith.andi %30, %59 : vector<2x8x1xi1>
    %61 = arith.extui %60 : vector<2x8x1xi1> to vector<2x8x1xi32>
    %62 = arith.sitofp %61 : vector<2x8x1xi32> to vector<2x8x1xf32>
    %63 = vector.shape_cast %62 : vector<2x8x1xf32> to vector<1x2x8x1xf32>
    %cst_16 = arith.constant dense<0.000000e+00> : vector<1xf32>
    %64 = vector.multi_reduction <add>, %63, %cst_16 [1, 2, 3] : vector<1x2x8x1xf32> to vector<1xf32>
    %65 = vector.shape_cast %64 : vector<1xf32> to vector<1x1x1x1xf32>
    %66 = vector.extract %65[0, 0, 0, 0] : f32 from vector<1x1x1x1xf32>
    %67 = vector.shape_cast %44 : vector<2x8x1xf32> to vector<1x2x8x1xf32>
    %cst_17 = arith.constant dense<0.000000e+00> : vector<1xf32>
    %68 = vector.multi_reduction <add>, %67, %cst_17 [1, 2, 3] : vector<1x2x8x1xf32> to vector<1xf32>
    %69 = vector.shape_cast %68 : vector<1xf32> to vector<1x1x1x1xf32>
    %70 = vector.extract %69[0, 0, 0, 0] : f32 from vector<1x1x1x1xf32>
    %c0_18 = arith.constant 0 : index
    %c0_19 = arith.constant 0 : index
    %71 = memref.load %arg3[%c0_18, %c0_19] : memref<1x8xf32, #tpu.memory_space<smem>>
    memref.store %38, %arg3[%c0_18, %c0_19] : memref<1x8xf32, #tpu.memory_space<smem>>
    %c0_20 = arith.constant 0 : index
    %c1 = arith.constant 1 : index
    %72 = memref.load %arg3[%c0_20, %c1] : memref<1x8xf32, #tpu.memory_space<smem>>
    memref.store %42, %arg3[%c0_20, %c1] : memref<1x8xf32, #tpu.memory_space<smem>>
    %c0_21 = arith.constant 0 : index
    %c2 = arith.constant 2 : index
    %73 = memref.load %arg3[%c0_21, %c2] : memref<1x8xf32, #tpu.memory_space<smem>>
    memref.store %58, %arg3[%c0_21, %c2] : memref<1x8xf32, #tpu.memory_space<smem>>
    %c0_22 = arith.constant 0 : index
    %c3 = arith.constant 3 : index
    %74 = memref.load %arg3[%c0_22, %c3] : memref<1x8xf32, #tpu.memory_space<smem>>
    memref.store %66, %arg3[%c0_22, %c3] : memref<1x8xf32, #tpu.memory_space<smem>>
    %c0_23 = arith.constant 0 : index
    %c4 = arith.constant 4 : index
    %75 = memref.load %arg3[%c0_23, %c4] : memref<1x8xf32, #tpu.memory_space<smem>>
    memref.store %70, %arg3[%c0_23, %c4] : memref<1x8xf32, #tpu.memory_space<smem>>
    %cst_24 = arith.constant 0.000000e+00 : f32
    %c0_25 = arith.constant 0 : index
    %c5 = arith.constant 5 : index
    %76 = memref.load %arg3[%c0_25, %c5] : memref<1x8xf32, #tpu.memory_space<smem>>
    memref.store %cst_24, %arg3[%c0_25, %c5] : memref<1x8xf32, #tpu.memory_space<smem>>
    %cst_26 = arith.constant 0.000000e+00 : f32
    %c0_27 = arith.constant 0 : index
    %c6 = arith.constant 6 : index
    %77 = memref.load %arg3[%c0_27, %c6] : memref<1x8xf32, #tpu.memory_space<smem>>
    memref.store %cst_26, %arg3[%c0_27, %c6] : memref<1x8xf32, #tpu.memory_space<smem>>
    %cst_28 = arith.constant 0.000000e+00 : f32
    %c0_29 = arith.constant 0 : index
    %c7 = arith.constant 7 : index
    %78 = memref.load %arg3[%c0_29, %c7] : memref<1x8xf32, #tpu.memory_space<smem>>
    memref.store %cst_28, %arg3[%c0_29, %c7] : memref<1x8xf32, #tpu.memory_space<smem>>
    return
  }
  func.func @transform_0(%arg0: i32) -> (i32, i32, i32) {
    %c0_i32 = arith.constant 0 : i32
    %c0_i32_0 = arith.constant 0 : i32
    %c0_i32_1 = arith.constant 0 : i32
    return %arg0, %c0_i32, %c0_i32_0 : i32, i32, i32
  }
  func.func @transform_1(%arg0: i32) -> (i32, i32) {
    %c0_i32 = arith.constant 0 : i32
    %c0_i32_0 = arith.constant 0 : i32
    return %arg0, %c0_i32 : i32, i32
  }
  func.func @transform_2(%arg0: i32) -> (i32, i32) {
    %c0_i32 = arith.constant 0 : i32
    %c0_i32_0 = arith.constant 0 : i32
    return %arg0, %c0_i32 : i32, i32
  }
}

</mosaic_0001>

<bundles_post_ra>
// kernel: tpu_custom_call.1
= control target key start
LH: loop header
LB: loop body
LE: loop exit
PB: predicated region body
PF: predicated region fallthrough
CT: control target
= control target key end

     0   :  { %vm31_vm0 = vcmask 39936   ;;  %s387_s0 = inlined_call_operand.vmem [shape: f32[2,8,5], index: 0, kind: input, shape index: {}]   ;;  %s388_s1 = inlined_call_operand.vmem [shape: s32[2,8], index: 1, kind: input, shape index: {}]   ;;  %s389_s2 = inlined_call_operand.hbm [shape: f32[1,8], index: 2, kind: output, shape index: {}]  }
   0x1   :  { %v307_v0 = vld [vmem:[%s387_s0] sm:$0xff]  ;;  %v312_v1 = vld [vmem:[%s387_s0 + $0x8] sm:$0xff] }
   0x2   :  { %7 = vsyncpa [#allocation3], 0  ;;  %v32_v2 = vsel %vm31_vm0, %v307_v0, -inf  ;;  %v35_v3 = vsel %vm31_vm0, %v312_v1, -inf  ;;  %v15_v4 = vlaneseq  ;;  %v14_v6 = vld [vmem:[%s388_s1] sm:$0x3] }
   0x3   :  { %33 = vmax.xlane.f32.xlu0 %v32_v2  ;;  %v285_v37 = vmov 0.1   ;;  %vm108_vm6 = vcmask 7168   ;;  %v286_v50 = vmov 0.0   ;;  %s287_s0 = smov 0.0   ;;  %s273_s21 = scalar_lea.hbm %s389_s2, 16 }
   0x4   :  { %v16_v5 = vshrl.u32 %v15_v4, 7  ;;  %v30_v11 = vand.u32 127, %v15_v4  ;;  %227 = sst [smem:[#allocation2 + $0x5]] %s287_s0  ;;  %p274_p0 = scmp.ne.s32.totalorder %s389_s2, %s273_s21 }
   0x5   :  { %229 = sst [smem:[#allocation2 + $0x6]] %s287_s0  ;;  %p277_p1 = scmp.lt.u32.totalorder %s273_s21, %s389_s2 }
   0x6   :  { %v24_v7 = vsub.s32 1, %v16_v5  ;;  %v17_v9 = vsub.s32 0, %v16_v5  ;;  %231 = sst [smem:[#allocation2 + $0x7]] %s287_s0 }
   0x7   :  { %36 = vmax.xlane.f32.xlu0 %v35_v3  ;;  %p279_p2 = pnand %p277_p1, %p274_p0 }
   0x8   :  { %v25_v8 = vrot.slane %v14_v6, %v24_v7  ;;  %v18_v10 = vrot.slane %v14_v6, %v17_v9 }
  0x1d   :  { %20 = vbcast.lane.b32.xlu0 %v18_v10, 256 }
  0x90   :  { %v321_v12 = vpop.xlane.xlu0 %33 }
  0x91   :  { %vm38_vm1 = vcmp.eq.f32.partialorder %v307_v0, %v321_v12  ;;  %v72_v24 = vsub.f32 %v307_v0, %v321_v12 }
  0x92   :  { %v40_v13 = vsel %vm38_vm1, %v30_v11, 5 }
  0x93   :  { %v42_v14 = vsel %vm31_vm0, %v40_v13, 2147483647  ;;  %v74_v25 = vmul.f32 1.442695, %v72_v24 }
  0x94   :  { %v326_v15 = vpop.xlane.xlu0 %36  ;;  %v44_v16 = vshra.s32 %v42_v14, 16  ;;  %v43_v26 = vand.u32 65535, %v42_v14 }
  0x95   :  { %vm39_vm2 = vcmp.eq.f32.partialorder %v312_v1, %v326_v15  ;;  %v73_v22 = vsub.f32 %v312_v1, %v326_v15 }
  0x96   :  { %v46_v17 = vcvt.s32.f32 %v44_v16  ;;  %v41_v18 = vsel %vm39_vm2, %v30_v11, 5  ;;  %v45_v28 = vcvt.s32.f32 %v43_v26 }
  0x97   :  { %v57_v19 = vsel %vm31_vm0, %v41_v18, 2147483647  ;;  %v76_v23 = vmul.f32 1.442695, %v73_v22 }
  0x98   :  { %47 = vmin.xlane.f32.xlu1 %v46_v17  ;;  %v59_v20 = vshra.s32 %v57_v19, 16  ;;  %v58_v29 = vand.u32 65535, %v57_v19  ;;  %v21_v30 = vpop.permute.xlu0 %20 }
  0x99   :  { %265 = vpow2.f32 %v76_v23  ;;  %vm102_vm4 = vcmp.ne.s32.totalorder %v21_v30, 4  ;;  %vm90_vm7 = vcmp.eq.s32.totalorder %v30_v11, %v21_v30 }
  0x9a   :  { %v61_v21 = vcvt.s32.f32 %v59_v20  ;;  %267 = vpow2.f32 %v74_v25  ;;  %v60_v34 = vcvt.s32.f32 %v58_v29  ;;  %v337_v38 = vsel %vm102_vm4, 1.0, %v285_v37 }
  0x9b   :  { %v121_v41 = vsel %vm108_vm6, %v337_v38, 0.0  ;;  %v92_v42 = vsel %vm90_vm7, %v307_v0, 0.0  ;;  %v352_v51 = vsel %vm102_vm4, 1.0, %v286_v50 }
  0x9c   :  { %62 = vmin.xlane.f32.xlu1 %v61_v21  ;;  %v94_v49 = vsel %vm31_vm0, %v92_v42, 0.0  ;;  %v143_v52 = vrot.slane %v352_v51, 4 }
  0x9e   :  { %v144_v57 = vadd.f32 %v352_v51, %v143_v52 }
  0xa0   :  { %v145_v0 = vrot.slane %v144_v57, 2 }
  0xa2   :  { %v146_v10 = vadd.f32 %v145_v0, %v144_v57 }
  0xa3   :  { %v266_v31 = vpop.eup %265 }
  0xa4   :  { %v81_v35 = vsel %vm31_vm0, %v266_v31, 0.0  ;;  %v268_v39 = vpop.eup %267  ;;  %v147_v20 = vrot.slane %v146_v10, 1 }
  0xa5   :  { %v78_v43 = vsel %vm31_vm0, %v268_v39, 0.0 }
  0xad   :  { %27 = vbcast.lane.b32.xlu1 %v25_v8, 256 }
 0x125   :  { %v48_v27 = vpop.xlane.xlu1 %47 }
 0x126   :  { %vm49_vm3 = vcmp.eq.f32.partialorder %v46_v17, %v48_v27  ;;  %v54_v53 = vcvt.f32.s32 %v48_v27 }
 0x127   :  { %v50_v32 = vsel %vm49_vm3, %v45_v28, inf }
 0x128   :  { %51 = vmin.xlane.f32.xlu1 %v50_v32  ;;  %v55_v59 = vshll.u32 %v54_v53, 16 }
 0x129   :  { %v63_v33 = vpop.xlane.xlu1 %62 }
 0x12a   :  { %vm64_vm5 = vcmp.eq.f32.partialorder %v61_v21, %v63_v33  ;;  %v69_v55 = vcvt.f32.s32 %v63_v33 }
 0x12b   :  { %v65_v36 = vsel %vm64_vm5, %v60_v34, inf }
 0x12c   :  { %82 = vadd.xlane.f32.xlu1 %v81_v35  ;;  %66 = vmin.xlane.f32.xlu0 %v65_v36  ;;  %v70_v62 = vshll.u32 %v69_v55, 16 }
 0x12d   :  { %v28_v40 = vpop.permute.xlu1 %27 }
 0x12e   :  { %vm103_vm8 = vcmp.ne.s32.totalorder %v28_v40, 4  ;;  %vm91_vm9 = vcmp.eq.s32.totalorder %v30_v11, %v28_v40 }
 0x12f   :  { %v93_v44 = vsel %vm91_vm9, %v312_v1, 0.0  ;;  %v345_v45 = vsel %vm103_vm8, 1.0, %v285_v37  ;;  %v356_v54 = vsel %vm103_vm8, 1.0, %v286_v50 }
 0x130   :  { %79 = vadd.xlane.f32.xlu0 %v78_v43  ;;  %v97_v46 = vsel %vm31_vm0, %v93_v44, 0.0  ;;  %v122_v47 = vsel %vm108_vm6, %v345_v45, 0.0  ;;  %v149_v56 = vrot.slane %v356_v54, 4  ;;  %vm171_vm0 = vcmask 0  }
 0x131   :  { %98 = vadd.xlane.f32.xlu1 %v97_v46  ;;  %v123_v48 = vadd.f32 %v122_v47, %v121_v41 }
 0x132   :  { %v150_v63 = vadd.f32 %v356_v54, %v149_v56 }
 0x134   :  { %95 = vadd.xlane.f32.xlu0 %v94_v49  ;;  %v151_v7 = vrot.slane %v150_v63, 2 }
 0x135   :  { %124 = vadd.xlane.f32.xlu1 %v123_v48 }
 0x136   :  { %v152_v24 = vadd.f32 %v151_v7, %v150_v63 }
 0x138   :  { %v153_v31 = vrot.slane %v152_v24, 1 }
 0x13a   :  { %v154_v42 = vadd.f32 %v153_v31, %v152_v24 }
 0x1b5   :  { %v52_v58 = vpop.xlane.xlu1 %51 }
 0x1b6   :  { %v53_v60 = vcvt.f32.s32 %v52_v58 }
 0x1b8   :  { %v56_v61 = vadd.s32 %v55_v59, %v53_v60 }
 0x1b9   :  { %v83_v1 = vpop.xlane.xlu1 %82  ;;  %v67_v2 = vpop.xlane.xlu0 %66 }
 0x1ba   :  { %vm137_vm10 = vcmp.ne.s32.totalorder %v56_v61, 4  ;;  %vm184_vm11 = vcmp.eq.s32.totalorder %v56_v61, %v21_v30  ;;  %269 = vlog2.f32 %v83_v1  ;;  %v68_v3 = vcvt.f32.s32 %v67_v2 }
 0x1bb   :  { %v247_v4 = vsel %vm137_vm10, 1.0, %v286_v50  ;;  %vm186_vm12 = vmand %vm102_vm4, %vm184_vm11  ;;  %v148_v30 = vadd.f32 %v147_v20, %v146_v10 }
 0x1bc   :  { %v155_v5 = vrot.slane %v247_v4, 4  ;;  %v71_v6 = vadd.s32 %v70_v62, %v68_v3  ;;  %v249_v9 = vsel %vm186_vm12, 1.0, %v286_v50 }
 0x1bd   :  { %v80_v8 = vpop.xlane.xlu0 %79  ;;  %v192_v18 = vsel %vm108_vm6, %v249_v9, 0.0 }
 0x1be   :  { %v156_v11 = vadd.f32 %v247_v4, %v155_v5  ;;  %vm138_vm13 = vcmp.ne.s32.totalorder %v71_v6, 4  ;;  %vm185_vm14 = vcmp.eq.s32.totalorder %v71_v6, %v28_v40  ;;  %271 = vlog2.f32 %v80_v8  ;;  %v99_v35 = vpop.xlane.xlu1 %98 }
 0x1bf   :  { %v248_v13 = vsel %vm138_vm13, 1.0, %v286_v50  ;;  %vm187_vm15 = vmand %vm103_vm8, %vm185_vm14 }
 0x1c0   :  { %v157_v14 = vrot.slane %v156_v11, 2  ;;  %v161_v16 = vrot.slane %v248_v13, 4  ;;  %v250_v17 = vsel %vm187_vm15, 1.0, %v286_v50 }
 0x1c1   :  { %v193_v19 = vsel %vm108_vm6, %v250_v17, 0.0  ;;  %v96_v41 = vpop.xlane.xlu0 %95 }
 0x1c2   :  { %v158_v21 = vadd.f32 %v157_v14, %v156_v11  ;;  %v162_v22 = vadd.f32 %v248_v13, %v161_v16  ;;  %v194_v23 = vadd.f32 %v193_v19, %v192_v18 }
 0x1c4   :  { %v270_v25 = vpop.eup %269  ;;  %v163_v26 = vrot.slane %v162_v22, 2  ;;  %195 = vadd.xlane.f32.xlu1 %v194_v23  ;;  %v159_v27 = vrot.slane %v158_v21, 1 }
 0x1c5   :  { %v87_v28 = vmul.f32 0.6931472, %v270_v25 }
 0x1c6   :  { %v164_v29 = vadd.f32 %v163_v26, %v162_v22  ;;  %v160_v32 = vadd.f32 %v159_v27, %v158_v21 }
 0x1c7   :  { %v89_v33 = vadd.f32 %v87_v28, %v326_v15 }
 0x1c8   :  { %v272_v34 = vpop.eup %271  ;;  %v165_v36 = vrot.slane %v164_v29, 1  ;;  %v167_v37 = vsub.f32 %v160_v32, %v148_v30 }
 0x1c9   :  { %v85_v39 = vmul.f32 0.6931472, %v272_v34  ;;  %v101_v40 = vsub.f32 %v89_v33, %v99_v35 }
 0x1ca   :  { %v166_v43 = vadd.f32 %v165_v36, %v164_v29  ;;  %v169_v47 = vand.u32 2147483647, %v167_v37 }
 0x1cb   :  { %v88_v44 = vadd.f32 %v85_v39, %v321_v12  ;;  %v107_v48 = vmul.f32 %v345_v45, %v101_v40  ;;  %v204_v12 = vsel %vm108_vm6, %v352_v51, 0.0  ;;  %v205_v45 = vsel %vm108_vm6, %v356_v54, 0.0 }
 0x1cc   :  { %v168_v46 = vsub.f32 %v166_v43, %v154_v42  ;;  %v172_v52 = vsel %vm171_vm0, %v169_v47, 0.0  ;;  %v206_v59 = vadd.f32 %v205_v45, %v204_v12 }
 0x1cd   :  { %v100_v49 = vsub.f32 %v88_v44, %v96_v41  ;;  %v110_v56 = vsel %vm108_vm6, %v107_v48, 0.0 }
 0x1ce   :  { %v170_v50 = vand.u32 2147483647, %v168_v46 }
 0x1cf   :  { %v106_v15 = vmul.f32 %v337_v38, %v100_v49  ;;  %v125_v38 = vpop.xlane.xlu1 %124 }
 0x1d0   :  { %v173_v53 = vsel %vm171_vm0, %v170_v50, 0.0  ;;  %v126_v60 = vrot.slane %v125_v38, 4 }
 0x1d1   :  { %v109_v55 = vsel %vm108_vm6, %v106_v15, 0.0  ;;  %v174_v57 = vadd.f32 %v173_v53, %v172_v52 }
 0x1d2   :  { %v111_v58 = vadd.f32 %v110_v56, %v109_v55  ;;  %v127_v62 = vadd.f32 %v126_v60, %v125_v38 }
 0x1d4   :  { %112 = vadd.xlane.f32.xlu0 %v111_v58  ;;  %v128_v0 = vrot.slane %v127_v62, 2 }
 0x1d6   :  { %v129_v54 = vadd.f32 %v128_v0, %v127_v62 }
 0x1d8   :  { %175 = vadd.xlane.f32.xlu0 %v174_v57  ;;  %v130_v13 = vrot.slane %v129_v54, 1 }
 0x1da   :  { %v131_v21 = vadd.f32 %v130_v13, %v129_v54 }
 0x1dc   :  { %207 = vadd.xlane.f32.xlu0 %v206_v59 }
 0x251   :  { %v196_v61 = vpop.xlane.xlu1 %195 }
 0x252   :  { %v197_v63 = vrot.slane %v196_v61, 4 }
 0x254   :  { %v198_v1 = vadd.f32 %v197_v63, %v196_v61 }
 0x256   :  { %v199_v4 = vrot.slane %v198_v1, 2 }
 0x258   :  { %v200_v10 = vadd.f32 %v199_v4, %v198_v1 }
 0x25a   :  { %v201_v22 = vrot.slane %v200_v10, 1 }
 0x25c   :  { %v202_v27 = vadd.f32 %v201_v22, %v200_v10 }
 0x261   :  { %v113_v2 = vpop.xlane.xlu0 %112 }
 0x262   :  { %v114_v3 = vrot.slane %v113_v2, 4 }
 0x264   :  { %v115_v51 = vadd.f32 %v114_v3, %v113_v2 }
 0x265   :  { %v176_v5 = vpop.xlane.xlu0 %175 }
 0x266   :  { %v116_v6 = vrot.slane %v115_v51, 2  ;;  %v177_v7 = vrot.slane %v176_v5, 4 }
 0x268   :  { %v178_v8 = vadd.f32 %v177_v7, %v176_v5  ;;  %v117_v9 = vadd.f32 %v116_v6, %v115_v51 }
 0x269   :  { %v208_v11 = vpop.xlane.xlu0 %207 }
 0x26a   :  { %v179_v14 = vrot.slane %v178_v8, 2  ;;  %v209_v16 = vrot.slane %v208_v11, 4  ;;  %v118_v17 = vrot.slane %v117_v9, 1 }
 0x26c   :  { %v210_v18 = vadd.f32 %v209_v16, %v208_v11  ;;  %v119_v19 = vadd.f32 %v118_v17, %v117_v9  ;;  %v180_v20 = vadd.f32 %v179_v14, %v178_v8 }
 0x26e   :  { %v211_v23 = vrot.slane %v210_v18, 2  ;;  %251 = vpush %v119_v19  ;;  %v181_v24 = vrot.slane %v180_v20, 1 }
 0x26f   :  { %253 = vpush %v131_v21 }
 0x270   :  { %v212_v25 = vadd.f32 %v211_v23, %v210_v18  ;;  %v182_v26 = vadd.f32 %v181_v24, %v180_v20 }
 0x272   :  { %255 = vpush %v182_v26  ;;  %v213_v28 = vrot.slane %v212_v25, 1 }
 0x273   :  { %257 = vpush %v202_v27 }
 0x274   :  { %v214_v29 = vadd.f32 %v213_v28, %v212_v25 }
 0x276   :  { %259 = vpush %v214_v29 }
 0x29f   :  { %s252_s1 = spop %251 }
 0x2a0   :  { %217 = sst [smem:[#allocation2]] %s252_s1  ;;  %s254_s15 = spop %253 }
 0x2a1   :  { %219 = sst [smem:[#allocation2 + $0x1]] %s254_s15 }
 0x2a3   :  { %s256_s16 = spop %255 }
 0x2a4   :  { %221 = sst [smem:[#allocation2 + $0x2]] %s256_s16  ;;  %s258_s17 = spop %257 }
 0x2a5   :  { %223 = sst [smem:[#allocation2 + $0x3]] %s258_s17 }
 0x2a7   :  { %s260_s18 = spop %259 }
 0x2a8   :  { %225 = sst [smem:[#allocation2 + $0x4]] %s260_s18 }
 0x2a9   :  { %282 = shalt.err (!%p279_p2)
}
 0x2aa   :  { %s288_s26 = smov [#allocation2]  }
 0x2ab   :  { %239 = dma.smem_to_hbm %s288_s26, 16, %s389_s2, [#allocation3]  }
 0x2ac   :  { %283 = dma.done.wait [#allocation3], 16  }
 0x2ad   :  { %284 = vsyncadd [#allocation3], 4294967280 }
 0x2ae   :  { %243 = sfence }
 0x2af   :  { %244 = vsyncpa [#allocation3], 1 }

</bundles_post_ra>
